<compile_context>
chip_gen: v5e
topology: v5e:2x2
jax: 0.10.0
libtpu: 0.0.40
codegen_flags: <defaults>
</compile_context>

<pallas_src>
import jax
import jax.numpy as jnp
from jax.experimental import pallas as pl
from jax.experimental.pallas import tpu as pltpu

NUM_TRAIN_TIMESTEPS = 1000
MAX_TILE_ROWS = 512                 # ~85% HBM roofline at 512-row tiles (v6e data)
VMEM_LIMIT_BYTES = 48 * 1024 * 1024  # explicit scoped-VMEM limit, v7x-safe headroom


def _cdiv(a, b):
    return -(-a // b)


def _round_up(a, b):
    return _cdiv(a, b) * b


# --------------------------- fused Pallas kernel ---------------------------

def _make_fused_kernel(with_controlnet: bool):
    """Fused: DDPM add_noise + conditioning + sparse/obj encoders + denoiser MLP
    (+ controlnet MLP + residual add).  One grid step = one (TILE_R, D) row slab
    of the flattened (B*S) row axis."""

    def kernel(*refs):
        if with_controlnet:
            (c0_ref, c1_ref, lat_ref, noi_ref, sp_ref, te_ref, obj_ref,
             enc_w, enc_b, den_w1, den_b1, den_w2, den_b2,
             obj_w, obj_b, ctl_w1, ctl_b1, ctl_w2, ctl_b2,
             out_ref) = refs
        else:
            (c0_ref, c1_ref, lat_ref, noi_ref, sp_ref, te_ref,
             enc_w, enc_b, den_w1, den_b1, den_w2, den_b2,
             out_ref) = refs

        def silu(x):
            # sigmoid(x) = 1 / (1 + exp(-x)); exp and approx reciprocal both
            # run on the EUP slot -> no f32 VALU divide (v5e-friendly).
            e = jnp.exp(jnp.minimum(-x, 30.0))   # clamp avoids inf -> NaN
            return x * pl.reciprocal(1.0 + e, approx=True)

        def mm(a_f32, w_ref, b_ref):
            # bf16 MXU operands, f32 accumulation, f32 bias add.
            return jnp.dot(a_f32.astype(jnp.bfloat16), w_ref[...],
                           preferred_element_type=jnp.float32) + b_ref[...]

        # sparse_emb = sparse_encoder(sparse)
        sparse_emb = silu(mm(sp_ref[...], enc_w, enc_b))

        # noisy_latent = sqrt(acp[t]) * latent + sqrt(1-acp[t]) * noise
        # (per-row (TILE_R,1) coefficients broadcast over lanes)
        noisy = (c0_ref[...] * lat_ref[...]
                 + c1_ref[...] * noi_ref[...].astype(jnp.float32))

        # denoiser conditioning: additive (sparse emb + per-row timestep emb)
        h = noisy + sparse_emb + te_ref[...].astype(jnp.float32)

        # denoiser: 2-layer SiLU MLP
        den = mm(silu(mm(h, den_w1, den_b1)), den_w2, den_b2)

        if with_controlnet:
            # controlnet ('residual'): obj-conditioned MLP, residual-added
            obj_emb = silu(mm(obj_ref[...], obj_w, obj_b))
            ctl = mm(silu(mm(h + obj_emb, ctl_w1, ctl_b1)), ctl_w2, ctl_b2)
            out = den + ctl            # pred_latent = denoiser(...) + controlnet(...)
        else:
            out = den

        out_ref[...] = out.astype(out_ref.dtype)

    return kernel


def _choose_row_tiling(rows, max_tile=MAX_TILE_ROWS):
    """Tile size (multiple of 8, <= max_tile) and tile count so padding waste is
    minimal; never returns a whole huge sequence as one tile."""
    rows8 = _round_up(max(rows, 1), 8)
    n_tiles = max(1, _cdiv(rows8, max_tile))
    tile = _round_up(_cdiv(rows8, n_tiles), 8)
    return tile, n_tiles


def _fused_rows(c0_r, c1_r, lat_r, noi_r, sp_r, te_r, obj_r, params,
                tile_r, n_tiles, out_dtype):
    R, D = lat_r.shape
    with_controlnet = obj_r is not None

    def act_spec(feat):
        # lane-dense (TILE_R, feat) slab over the flattened row axis
        return pl.BlockSpec((tile_r, feat), lambda r: (r, 0))

    col_spec = pl.BlockSpec((tile_r, 1), lambda r: (r, 0))

    def resident(shape):
        # weights/biases: constant block index -> fetched once, kept in VMEM
        return pl.BlockSpec(shape, lambda r: (0, 0))

    inputs = [c0_r, c1_r, lat_r, noi_r, sp_r, te_r]
    in_specs = [col_spec, col_spec, act_spec(D), act_spec(D),
                act_spec(sp_r.shape[-1]), act_spec(D)]
    if with_controlnet:
        inputs.append(obj_r)
        in_specs.append(act_spec(obj_r.shape[-1]))

    weight_names = ["enc_w", "enc_b", "den_w1", "den_b1", "den_w2", "den_b2"]
    if with_controlnet:
        weight_names += ["obj_w", "obj_b", "ctl_w1", "ctl_b1", "ctl_w2", "ctl_b2"]
    for name in weight_names:
        w = params[name]
        inputs.append(w)
        in_specs.append(resident(w.shape))

    # Advisory cost estimate so XLA schedules neighbours around the call.
    H = params["den_w1"].shape[-1]
    Ks = sp_r.shape[-1]
    flops = 2 * R * (Ks * D + 2 * D * H)
    transcendentals = 2 * R * (D + H)
    if with_controlnet:
        Ko = obj_r.shape[-1]
        flops += 2 * R * (Ko * D + 2 * D * H)
        transcendentals += 2 * R * (D + H)
    bytes_accessed = (sum(int(x.size) * x.dtype.itemsize for x in inputs)
                      + R * D * jnp.dtype(out_dtype).itemsize)

    return pl.pallas_call(
        _make_fused_kernel(with_controlnet),
        out_shape=jax.ShapeDtypeStruct((R, D), out_dtype),
        grid=(n_tiles,),
        in_specs=in_specs,
        out_specs=act_spec(D),
        compiler_params=pltpu.CompilerParams(
            dimension_semantics=("parallel",),
            vmem_limit_bytes=VMEM_LIMIT_BYTES,
        ),
        cost_estimate=pl.CostEstimate(flops=flops,
                                      transcendentals=transcendentals,
                                      bytes_accessed=bytes_accessed),
    )(*inputs)


# ----------------------------- glue (plain JAX) -----------------------------

def timestep_embedding(t, dim):
    half = dim // 2
    freqs = jnp.exp(-jnp.log(10000.0) * jnp.arange(half, dtype=jnp.float32) / half)
    args = t.astype(jnp.float32)[:, None] * freqs[None, :]
    emb = jnp.concatenate([jnp.sin(args), jnp.cos(args)], axis=-1)
    if dim % 2:
        emb = jnp.pad(emb, ((0, 0), (0, 1)))
    return emb


def _sample_diffusion_inputs(key, latent_shape, dim):
    """noise ~ randn_like(latent) (bf16 stream); timesteps ~ randint; DDPM coeffs."""
    B = latent_shape[0]
    k_noise, k_t = jax.random.split(key)
    # Sampled directly in bf16: it only feeds c1*noise and halves its HBM stream.
    noise = jax.random.normal(k_noise, latent_shape, dtype=jnp.bfloat16)
    timesteps = jax.random.randint(k_t, (B,), 0, NUM_TRAIN_TIMESTEPS)
    betas = jnp.linspace(1e-4, 2e-2, NUM_TRAIN_TIMESTEPS, dtype=jnp.float32)
    acp = jnp.cumprod(1.0 - betas)
    c0 = jnp.sqrt(acp)[timesteps].astype(jnp.float32)
    c1 = jnp.sqrt(1.0 - acp)[timesteps].astype(jnp.float32)
    temb = timestep_embedding(timesteps, dim)          # (B, D) f32
    return noise, c0, c1, temb


def init_params(key, sparse_dim, obj_dim, latent_dim, hidden):
    ks = jax.random.split(key, 6)

    def w(k, shape, scale=0.1):
        # weights stored in bf16 (MXU-native, half the HBM/VMEM traffic)
        return (scale * jax.random.normal(k, shape, dtype=jnp.float32)).astype(jnp.bfloat16)

    def b(n):
        return jnp.zeros((1, n), jnp.float32)

    return dict(
        enc_w=w(ks[0], (sparse_dim, latent_dim)), enc_b=b(latent_dim),
        obj_w=w(ks[1], (obj_dim, latent_dim)), obj_b=b(latent_dim),
        den_w1=w(ks[2], (latent_dim, hidden)), den_b1=b(hidden),
        den_w2=w(ks[3], (hidden, latent_dim)), den_b2=b(latent_dim),
        ctl_w1=w(ks[4], (latent_dim, hidden)), ctl_b1=b(hidden),
        ctl_w2=w(ks[5], (hidden, latent_dim)), ctl_b2=b(latent_dim),
    )


def control_md_forward(params, latent, sparse, body_latent=None, obj_info=None, *,
                       key, out_dtype=jnp.float32):
    """Mirrors ControlMD.forward.  obj_info=None -> denoiser-only path.
    out_dtype=jnp.bfloat16 halves output write traffic if the consumer allows it."""
    del body_latent  # TODO(synk): body_latent routing depends on the external denoiser config.
    B, S, D = latent.shape
    R = B * S
    noise, c0, c1, temb = _sample_diffusion_inputs(key, (B, S, D), D)

    tile_r, n_tiles = _choose_row_tiling(R)
    R_pad = tile_r * n_tiles

    def rows(x, dtype):
        x = x.reshape(R, x.shape[-1]).astype(dtype)
        if R_pad != R:
            x = jnp.pad(x, ((0, R_pad - R), (0, 0)))
        return x

    lat_r = rows(latent, jnp.float32)
    noi_r = rows(noise, jnp.bfloat16)
    sp_r = rows(sparse, jnp.bfloat16)                   # matmul-only -> bf16 stream
    obj_r = rows(obj_info, jnp.bfloat16) if obj_info is not None else None
    te_r = rows(jnp.broadcast_to(temb[:, None, :], (B, S, D)), jnp.bfloat16)
    c0_r = rows(jnp.broadcast_to(c0[:, None, None], (B, S, 1)), jnp.float32)
    c1_r = rows(jnp.broadcast_to(c1[:, None, None], (B, S, 1)), jnp.float32)

    out = _fused_rows(c0_r, c1_r, lat_r, noi_r, sp_r, te_r, obj_r, params,
                      tile_r, n_tiles, out_dtype)
    return out[:R].reshape(B, S, D)


def _reference_forward(params, latent, sparse, obj_info, noise, c0, c1, temb):
    """Pure-JAX reference with the same bf16/f32 mixed precision as the kernel."""
    B, S, D = latent.shape

    def silu(x):
        return x * jax.nn.sigmoid(x)

    def dotf(a, w):
        return jnp.dot(a.astype(jnp.bfloat16), w, preferred_element_type=jnp.float32)

    sp = silu(dotf(sparse.reshape(B * S, -1), params["enc_w"]) + params["enc_b"])
    noisy = c0[:, None, None] * latent + c1[:, None, None] * noise.astype(jnp.float32)
    temb_b = temb.astype(jnp.bfloat16).astype(jnp.float32)   # kernel streams temb in bf16
    h = (noisy + sp.reshape(B, S, D) + temb_b[:, None, :]).reshape(B * S, D)
    z = silu(dotf(h, params["den_w1"]) + params["den_b1"])
    out = dotf(z, params["den_w2"]) + params["den_b2"]
    if obj_info is not None:
        ob = silu(dotf(obj_info.reshape(B * S, -1), params["obj_w"]) + params["obj_b"])
        z2 = silu(dotf(h + ob, params["ctl_w1"]) + params["ctl_b1"])
        out = out + dotf(z2, params["ctl_w2"]) + params["ctl_b2"]
    return out.reshape(B, S, D)


if __name__ == "__main__":
    bs, seq = 2, 8
    latent_dim, sparse_dim, obj_dim, hidden = 128, 128, 128, 256  # lane-dense dims

    root = jax.random.PRNGKey(0)
    k_par, k_lat, k_sp, k_obj, k_fwd = jax.random.split(root, 5)

    params = init_params(k_par, sparse_dim, obj_dim, latent_dim, hidden)
    latent = jax.random.normal(k_lat, (bs, seq, latent_dim), dtype=jnp.float32)
    sparse = jax.random.normal(k_sp, (bs, seq, sparse_dim), dtype=jnp.float32)
    obj_info = jax.random.normal(k_obj, (bs, seq, obj_dim), dtype=jnp.float32)

    pred = control_md_forward(params, latent, sparse, body_latent=None,
                              obj_info=obj_info, key=k_fwd)
    pred = jax.block_until_ready(pred)
    assert pred.shape == (bs, seq, latent_dim) and pred.dtype == jnp.float32
    assert bool(jnp.isfinite(pred).all())

    # Numerical check against a pure-JAX reference using identical sampled
    # noise / timesteps / DDPM coefficients (same key, same sampler).
    # Tolerance covers bf16 operand rounding + the EUP-approx sigmoid reciprocal.
    noise, c0, c1, temb = _sample_diffusion_inputs(k_fwd, latent.shape, latent_dim)
    ref = _reference_forward(params, latent, sparse, obj_info, noise, c0, c1, temb)
    err = float(jnp.max(jnp.abs(pred.astype(jnp.float32) - ref)))
    assert err < 1e-1, f"max |pred - ref| = {err}"

    print("KERNEL_OK")
</pallas_src>

<mosaic_0001>
module attributes {stable_mosaic.version = 11 : i64} {
  func.func @kernel(%arg0: i32, %arg1: memref<16x1xf32, #tpu.memory_space<vmem>>, %arg2: memref<16x1xf32, #tpu.memory_space<vmem>>, %arg3: memref<16x128xf32, #tpu.memory_space<vmem>>, %arg4: memref<16x128xbf16, #tpu.memory_space<vmem>>, %arg5: memref<16x128xbf16, #tpu.memory_space<vmem>>, %arg6: memref<16x128xbf16, #tpu.memory_space<vmem>>, %arg7: memref<16x128xbf16, #tpu.memory_space<vmem>>, %arg8: memref<128x128xbf16, #tpu.memory_space<vmem>>, %arg9: memref<1x128xf32, #tpu.memory_space<vmem>>, %arg10: memref<128x256xbf16, #tpu.memory_space<vmem>>, %arg11: memref<1x256xf32, #tpu.memory_space<vmem>>, %arg12: memref<256x128xbf16, #tpu.memory_space<vmem>>, %arg13: memref<1x128xf32, #tpu.memory_space<vmem>>, %arg14: memref<128x128xbf16, #tpu.memory_space<vmem>>, %arg15: memref<1x128xf32, #tpu.memory_space<vmem>>, %arg16: memref<128x256xbf16, #tpu.memory_space<vmem>>, %arg17: memref<1x256xf32, #tpu.memory_space<vmem>>, %arg18: memref<256x128xbf16, #tpu.memory_space<vmem>>, %arg19: memref<1x128xf32, #tpu.memory_space<vmem>>, %arg20: memref<16x128xf32, #tpu.memory_space<vmem>>) attributes {dimension_semantics = [#tpu.dimension_semantics<parallel>], iteration_bounds = array<i64: 1>, scalar_prefetch = 0 : i64, scratch_operands = 0 : i64, tpu.core_type = #tpu.core_type<tc>, window_params = [{transform_indices = @transform_0, window_bounds = array<i64: 16, 1>}, {transform_indices = @transform_1, window_bounds = array<i64: 16, 1>}, {transform_indices = @transform_2, window_bounds = array<i64: 16, 128>}, {transform_indices = @transform_3, window_bounds = array<i64: 16, 128>}, {transform_indices = @transform_4, window_bounds = array<i64: 16, 128>}, {transform_indices = @transform_5, window_bounds = array<i64: 16, 128>}, {transform_indices = @transform_6, window_bounds = array<i64: 16, 128>}, {pipeline_mode = #tpu.pipeline_mode<synchronous>, transform_indices = @transform_7, window_bounds = array<i64: 128, 128>}, {pipeline_mode = #tpu.pipeline_mode<synchronous>, transform_indices = @transform_8, window_bounds = array<i64: 1, 128>}, {pipeline_mode = #tpu.pipeline_mode<synchronous>, transform_indices = @transform_9, window_bounds = array<i64: 128, 256>}, {pipeline_mode = #tpu.pipeline_mode<synchronous>, transform_indices = @transform_10, window_bounds = array<i64: 1, 256>}, {pipeline_mode = #tpu.pipeline_mode<synchronous>, transform_indices = @transform_11, window_bounds = array<i64: 256, 128>}, {pipeline_mode = #tpu.pipeline_mode<synchronous>, transform_indices = @transform_12, window_bounds = array<i64: 1, 128>}, {pipeline_mode = #tpu.pipeline_mode<synchronous>, transform_indices = @transform_13, window_bounds = array<i64: 128, 128>}, {pipeline_mode = #tpu.pipeline_mode<synchronous>, transform_indices = @transform_14, window_bounds = array<i64: 1, 128>}, {pipeline_mode = #tpu.pipeline_mode<synchronous>, transform_indices = @transform_15, window_bounds = array<i64: 128, 256>}, {pipeline_mode = #tpu.pipeline_mode<synchronous>, transform_indices = @transform_16, window_bounds = array<i64: 1, 256>}, {pipeline_mode = #tpu.pipeline_mode<synchronous>, transform_indices = @transform_17, window_bounds = array<i64: 256, 128>}, {pipeline_mode = #tpu.pipeline_mode<synchronous>, transform_indices = @transform_18, window_bounds = array<i64: 1, 128>}, {transform_indices = @transform_19, window_bounds = array<i64: 16, 128>}]} {
    %c0 = arith.constant 0 : index
    %c0_0 = arith.constant 0 : index
    %0 = vector.load %arg5[%c0, %c0_0] : memref<16x128xbf16, #tpu.memory_space<vmem>>, vector<16x128xbf16>
    %c0_1 = arith.constant 0 : index
    %c0_2 = arith.constant 0 : index
    %1 = vector.load %arg8[%c0_1, %c0_2] : memref<128x128xbf16, #tpu.memory_space<vmem>>, vector<128x128xbf16>
    %cst = arith.constant dense<0.000000e+00> : vector<16x128xf32>
    %2 = tpu.matmul %0, %1, %cst {dimension_numbers = #tpu.dot_dimension_numbers<[1], [0], [0], [1], [0, 0, 1, 1], [], []>} : vector<16x128xbf16>, vector<128x128xbf16>, vector<16x128xf32> -> vector<16x128xf32>
    %c0_3 = arith.constant 0 : index
    %c0_4 = arith.constant 0 : index
    %3 = vector.load %arg9[%c0_3, %c0_4] : memref<1x128xf32, #tpu.memory_space<vmem>>, vector<1x128xf32>
    %4 = vector.broadcast %3 : vector<1x128xf32> to vector<16x128xf32>
    %5 = arith.addf %2, %4 : vector<16x128xf32>
    %cst_5 = arith.constant 0.000000e+00 : f32
    %6 = vector.broadcast %cst_5 : f32 to vector<16x128xf32>
    %7 = arith.subf %6, %5 : vector<16x128xf32>
    %cst_6 = arith.constant 3.000000e+01 : f32
    %8 = vector.broadcast %cst_6 : f32 to vector<16x128xf32>
    %9 = arith.minimumf %7, %8 : vector<16x128xf32>
    %10 = math.exp %9 : vector<16x128xf32>
    %cst_7 = arith.constant 1.000000e+00 : f32
    %11 = vector.broadcast %cst_7 : f32 to vector<16x128xf32>
    %12 = arith.addf %11, %10 : vector<16x128xf32>
    %13 = tpu.reciprocal %12 {approx = true} : vector<16x128xf32> -> vector<16x128xf32>
    %14 = arith.mulf %5, %13 : vector<16x128xf32>
    %c0_8 = arith.constant 0 : index
    %c0_9 = arith.constant 0 : index
    %15 = vector.load %arg1[%c0_8, %c0_9] : memref<16x1xf32, #tpu.memory_space<vmem>>, vector<16x1xf32>
    %c0_10 = arith.constant 0 : index
    %c0_11 = arith.constant 0 : index
    %16 = vector.load %arg3[%c0_10, %c0_11] : memref<16x128xf32, #tpu.memory_space<vmem>>, vector<16x128xf32>
    %17 = vector.broadcast %15 : vector<16x1xf32> to vector<16x128xf32>
    %18 = arith.mulf %17, %16 : vector<16x128xf32>
    %c0_12 = arith.constant 0 : index
    %c0_13 = arith.constant 0 : index
    %19 = vector.load %arg2[%c0_12, %c0_13] : memref<16x1xf32, #tpu.memory_space<vmem>>, vector<16x1xf32>
    %c0_14 = arith.constant 0 : index
    %c0_15 = arith.constant 0 : index
    %20 = vector.load %arg4[%c0_14, %c0_15] : memref<16x128xbf16, #tpu.memory_space<vmem>>, vector<16x128xbf16>
    %21 = arith.extf %20 : vector<16x128xbf16> to vector<16x128xf32>
    %22 = vector.broadcast %19 : vector<16x1xf32> to vector<16x128xf32>
    %23 = arith.mulf %22, %21 : vector<16x128xf32>
    %24 = arith.addf %18, %23 : vector<16x128xf32>
    %25 = arith.addf %24, %14 : vector<16x128xf32>
    %c0_16 = arith.constant 0 : index
    %c0_17 = arith.constant 0 : index
    %26 = vector.load %arg6[%c0_16, %c0_17] : memref<16x128xbf16, #tpu.memory_space<vmem>>, vector<16x128xbf16>
    %27 = arith.extf %26 : vector<16x128xbf16> to vector<16x128xf32>
    %28 = arith.addf %25, %27 : vector<16x128xf32>
    %29 = arith.truncf %28 : vector<16x128xf32> to vector<16x128xbf16>
    %c0_18 = arith.constant 0 : index
    %c0_19 = arith.constant 0 : index
    %30 = vector.load %arg10[%c0_18, %c0_19] : memref<128x256xbf16, #tpu.memory_space<vmem>>, vector<128x256xbf16>
    %cst_20 = arith.constant dense<0.000000e+00> : vector<16x256xf32>
    %31 = tpu.matmul %29, %30, %cst_20 {dimension_numbers = #tpu.dot_dimension_numbers<[1], [0], [0], [1], [0, 0, 1, 1], [], []>} : vector<16x128xbf16>, vector<128x256xbf16>, vector<16x256xf32> -> vector<16x256xf32>
    %c0_21 = arith.constant 0 : index
    %c0_22 = arith.constant 0 : index
    %32 = vector.load %arg11[%c0_21, %c0_22] : memref<1x256xf32, #tpu.memory_space<vmem>>, vector<1x256xf32>
    %33 = vector.broadcast %32 : vector<1x256xf32> to vector<16x256xf32>
    %34 = arith.addf %31, %33 : vector<16x256xf32>
    %cst_23 = arith.constant 0.000000e+00 : f32
    %35 = vector.broadcast %cst_23 : f32 to vector<16x256xf32>
    %36 = arith.subf %35, %34 : vector<16x256xf32>
    %cst_24 = arith.constant 3.000000e+01 : f32
    %37 = vector.broadcast %cst_24 : f32 to vector<16x256xf32>
    %38 = arith.minimumf %36, %37 : vector<16x256xf32>
    %39 = math.exp %38 : vector<16x256xf32>
    %cst_25 = arith.constant 1.000000e+00 : f32
    %40 = vector.broadcast %cst_25 : f32 to vector<16x256xf32>
    %41 = arith.addf %40, %39 : vector<16x256xf32>
    %42 = tpu.reciprocal %41 {approx = true} : vector<16x256xf32> -> vector<16x256xf32>
    %43 = arith.mulf %34, %42 : vector<16x256xf32>
    %44 = arith.truncf %43 : vector<16x256xf32> to vector<16x256xbf16>
    %c0_26 = arith.constant 0 : index
    %c0_27 = arith.constant 0 : index
    %45 = vector.load %arg12[%c0_26, %c0_27] : memref<256x128xbf16, #tpu.memory_space<vmem>>, vector<256x128xbf16>
    %cst_28 = arith.constant dense<0.000000e+00> : vector<16x128xf32>
    %46 = tpu.matmul %44, %45, %cst_28 {dimension_numbers = #tpu.dot_dimension_numbers<[1], [0], [0], [1], [0, 0, 1, 1], [], []>} : vector<16x256xbf16>, vector<256x128xbf16>, vector<16x128xf32> -> vector<16x128xf32>
    %c0_29 = arith.constant 0 : index
    %c0_30 = arith.constant 0 : index
    %47 = vector.load %arg13[%c0_29, %c0_30] : memref<1x128xf32, #tpu.memory_space<vmem>>, vector<1x128xf32>
    %48 = vector.broadcast %47 : vector<1x128xf32> to vector<16x128xf32>
    %49 = arith.addf %46, %48 : vector<16x128xf32>
    %c0_31 = arith.constant 0 : index
    %c0_32 = arith.constant 0 : index
    %50 = vector.load %arg7[%c0_31, %c0_32] : memref<16x128xbf16, #tpu.memory_space<vmem>>, vector<16x128xbf16>
    %c0_33 = arith.constant 0 : index
    %c0_34 = arith.constant 0 : index
    %51 = vector.load %arg14[%c0_33, %c0_34] : memref<128x128xbf16, #tpu.memory_space<vmem>>, vector<128x128xbf16>
    %cst_35 = arith.constant dense<0.000000e+00> : vector<16x128xf32>
    %52 = tpu.matmul %50, %51, %cst_35 {dimension_numbers = #tpu.dot_dimension_numbers<[1], [0], [0], [1], [0, 0, 1, 1], [], []>} : vector<16x128xbf16>, vector<128x128xbf16>, vector<16x128xf32> -> vector<16x128xf32>
    %c0_36 = arith.constant 0 : index
    %c0_37 = arith.constant 0 : index
    %53 = vector.load %arg15[%c0_36, %c0_37] : memref<1x128xf32, #tpu.memory_space<vmem>>, vector<1x128xf32>
    %54 = vector.broadcast %53 : vector<1x128xf32> to vector<16x128xf32>
    %55 = arith.addf %52, %54 : vector<16x128xf32>
    %cst_38 = arith.constant 0.000000e+00 : f32
    %56 = vector.broadcast %cst_38 : f32 to vector<16x128xf32>
    %57 = arith.subf %56, %55 : vector<16x128xf32>
    %cst_39 = arith.constant 3.000000e+01 : f32
    %58 = vector.broadcast %cst_39 : f32 to vector<16x128xf32>
    %59 = arith.minimumf %57, %58 : vector<16x128xf32>
    %60 = math.exp %59 : vector<16x128xf32>
    %cst_40 = arith.constant 1.000000e+00 : f32
    %61 = vector.broadcast %cst_40 : f32 to vector<16x128xf32>
    %62 = arith.addf %61, %60 : vector<16x128xf32>
    %63 = tpu.reciprocal %62 {approx = true} : vector<16x128xf32> -> vector<16x128xf32>
    %64 = arith.mulf %55, %63 : vector<16x128xf32>
    %65 = arith.addf %28, %64 : vector<16x128xf32>
    %66 = arith.truncf %65 : vector<16x128xf32> to vector<16x128xbf16>
    %c0_41 = arith.constant 0 : index
    %c0_42 = arith.constant 0 : index
    %67 = vector.load %arg16[%c0_41, %c0_42] : memref<128x256xbf16, #tpu.memory_space<vmem>>, vector<128x256xbf16>
    %cst_43 = arith.constant dense<0.000000e+00> : vector<16x256xf32>
    %68 = tpu.matmul %66, %67, %cst_43 {dimension_numbers = #tpu.dot_dimension_numbers<[1], [0], [0], [1], [0, 0, 1, 1], [], []>} : vector<16x128xbf16>, vector<128x256xbf16>, vector<16x256xf32> -> vector<16x256xf32>
    %c0_44 = arith.constant 0 : index
    %c0_45 = arith.constant 0 : index
    %69 = vector.load %arg17[%c0_44, %c0_45] : memref<1x256xf32, #tpu.memory_space<vmem>>, vector<1x256xf32>
    %70 = vector.broadcast %69 : vector<1x256xf32> to vector<16x256xf32>
    %71 = arith.addf %68, %70 : vector<16x256xf32>
    %cst_46 = arith.constant 0.000000e+00 : f32
    %72 = vector.broadcast %cst_46 : f32 to vector<16x256xf32>
    %73 = arith.subf %72, %71 : vector<16x256xf32>
    %cst_47 = arith.constant 3.000000e+01 : f32
    %74 = vector.broadcast %cst_47 : f32 to vector<16x256xf32>
    %75 = arith.minimumf %73, %74 : vector<16x256xf32>
    %76 = math.exp %75 : vector<16x256xf32>
    %cst_48 = arith.constant 1.000000e+00 : f32
    %77 = vector.broadcast %cst_48 : f32 to vector<16x256xf32>
    %78 = arith.addf %77, %76 : vector<16x256xf32>
    %79 = tpu.reciprocal %78 {approx = true} : vector<16x256xf32> -> vector<16x256xf32>
    %80 = arith.mulf %71, %79 : vector<16x256xf32>
    %81 = arith.truncf %80 : vector<16x256xf32> to vector<16x256xbf16>
    %c0_49 = arith.constant 0 : index
    %c0_50 = arith.constant 0 : index
    %82 = vector.load %arg18[%c0_49, %c0_50] : memref<256x128xbf16, #tpu.memory_space<vmem>>, vector<256x128xbf16>
    %cst_51 = arith.constant dense<0.000000e+00> : vector<16x128xf32>
    %83 = tpu.matmul %81, %82, %cst_51 {dimension_numbers = #tpu.dot_dimension_numbers<[1], [0], [0], [1], [0, 0, 1, 1], [], []>} : vector<16x256xbf16>, vector<256x128xbf16>, vector<16x128xf32> -> vector<16x128xf32>
    %c0_52 = arith.constant 0 : index
    %c0_53 = arith.constant 0 : index
    %84 = vector.load %arg19[%c0_52, %c0_53] : memref<1x128xf32, #tpu.memory_space<vmem>>, vector<1x128xf32>
    %85 = vector.broadcast %84 : vector<1x128xf32> to vector<16x128xf32>
    %86 = arith.addf %83, %85 : vector<16x128xf32>
    %87 = arith.addf %49, %86 : vector<16x128xf32>
    %c0_54 = arith.constant 0 : index
    %c0_55 = arith.constant 0 : index
    %88 = vector.load %arg20[%c0_54, %c0_55] : memref<16x128xf32, #tpu.memory_space<vmem>>, vector<16x128xf32>
    tpu.vector_store %arg20[%c0_54, %c0_55], %87 {strides = array<i32>} : memref<16x128xf32, #tpu.memory_space<vmem>>, vector<16x128xf32>,
    return
  }
  func.func @transform_0(%arg0: i32) -> (i32, i32) {
    %c0_i32 = arith.constant 0 : i32
    %c0_i32_0 = arith.constant 0 : i32
    return %arg0, %c0_i32 : i32, i32
  }
  func.func @transform_1(%arg0: i32) -> (i32, i32) {
    %c0_i32 = arith.constant 0 : i32
    %c0_i32_0 = arith.constant 0 : i32
    return %arg0, %c0_i32 : i32, i32
  }
  func.func @transform_2(%arg0: i32) -> (i32, i32) {
    %c0_i32 = arith.constant 0 : i32
    %c0_i32_0 = arith.constant 0 : i32
    return %arg0, %c0_i32 : i32, i32
  }
  func.func @transform_3(%arg0: i32) -> (i32, i32) {
    %c0_i32 = arith.constant 0 : i32
    %c0_i32_0 = arith.constant 0 : i32
    return %arg0, %c0_i32 : i32, i32
  }
  func.func @transform_4(%arg0: i32) -> (i32, i32) {
    %c0_i32 = arith.constant 0 : i32
    %c0_i32_0 = arith.constant 0 : i32
    return %arg0, %c0_i32 : i32, i32
  }
  func.func @transform_5(%arg0: i32) -> (i32, i32) {
    %c0_i32 = arith.constant 0 : i32
    %c0_i32_0 = arith.constant 0 : i32
    return %arg0, %c0_i32 : i32, i32
  }
  func.func @transform_6(%arg0: i32) -> (i32, i32) {
    %c0_i32 = arith.constant 0 : i32
    %c0_i32_0 = arith.constant 0 : i32
    return %arg0, %c0_i32 : i32, i32
  }
  func.func @transform_7(%arg0: i32) -> (i32, i32) {
    %c0_i32 = arith.constant 0 : i32
    %c0_i32_0 = arith.constant 0 : i32
    %c0_i32_1 = arith.constant 0 : i32
    return %c0_i32, %c0_i32_0 : i32, i32
  }
  func.func @transform_8(%arg0: i32) -> (i32, i32) {
    %c0_i32 = arith.constant 0 : i32
    %c0_i32_0 = arith.constant 0 : i32
    %c0_i32_1 = arith.constant 0 : i32
    return %c0_i32, %c0_i32_0 : i32, i32
  }
  func.func @transform_9(%arg0: i32) -> (i32, i32) {
    %c0_i32 = arith.constant 0 : i32
    %c0_i32_0 = arith.constant 0 : i32
    %c0_i32_1 = arith.constant 0 : i32
    return %c0_i32, %c0_i32_0 : i32, i32
  }
  func.func @transform_10(%arg0: i32) -> (i32, i32) {
    %c0_i32 = arith.constant 0 : i32
    %c0_i32_0 = arith.constant 0 : i32
    %c0_i32_1 = arith.constant 0 : i32
    return %c0_i32, %c0_i32_0 : i32, i32
  }
  func.func @transform_11(%arg0: i32) -> (i32, i32) {
    %c0_i32 = arith.constant 0 : i32
    %c0_i32_0 = arith.constant 0 : i32
    %c0_i32_1 = arith.constant 0 : i32
    return %c0_i32, %c0_i32_0 : i32, i32
  }
  func.func @transform_12(%arg0: i32) -> (i32, i32) {
    %c0_i32 = arith.constant 0 : i32
    %c0_i32_0 = arith.constant 0 : i32
    %c0_i32_1 = arith.constant 0 : i32
    return %c0_i32, %c0_i32_0 : i32, i32
  }
  func.func @transform_13(%arg0: i32) -> (i32, i32) {
    %c0_i32 = arith.constant 0 : i32
    %c0_i32_0 = arith.constant 0 : i32
    %c0_i32_1 = arith.constant 0 : i32
    return %c0_i32, %c0_i32_0 : i32, i32
  }
  func.func @transform_14(%arg0: i32) -> (i32, i32) {
    %c0_i32 = arith.constant 0 : i32
    %c0_i32_0 = arith.constant 0 : i32
    %c0_i32_1 = arith.constant 0 : i32
    return %c0_i32, %c0_i32_0 : i32, i32
  }
  func.func @transform_15(%arg0: i32) -> (i32, i32) {
    %c0_i32 = arith.constant 0 : i32
    %c0_i32_0 = arith.constant 0 : i32
    %c0_i32_1 = arith.constant 0 : i32
    return %c0_i32, %c0_i32_0 : i32, i32
  }
  func.func @transform_16(%arg0: i32) -> (i32, i32) {
    %c0_i32 = arith.constant 0 : i32
    %c0_i32_0 = arith.constant 0 : i32
    %c0_i32_1 = arith.constant 0 : i32
    return %c0_i32, %c0_i32_0 : i32, i32
  }
  func.func @transform_17(%arg0: i32) -> (i32, i32) {
    %c0_i32 = arith.constant 0 : i32
    %c0_i32_0 = arith.constant 0 : i32
    %c0_i32_1 = arith.constant 0 : i32
    return %c0_i32, %c0_i32_0 : i32, i32
  }
  func.func @transform_18(%arg0: i32) -> (i32, i32) {
    %c0_i32 = arith.constant 0 : i32
    %c0_i32_0 = arith.constant 0 : i32
    %c0_i32_1 = arith.constant 0 : i32
    return %c0_i32, %c0_i32_0 : i32, i32
  }
  func.func @transform_19(%arg0: i32) -> (i32, i32) {
    %c0_i32 = arith.constant 0 : i32
    %c0_i32_0 = arith.constant 0 : i32
    return %arg0, %c0_i32 : i32, i32
  }
}

</mosaic_0001>

<bundles_post_ra>
// kernel: tpu_custom_call.1
= control target key start
LH: loop header
LB: loop body
LE: loop exit
PB: predicated region body
PF: predicated region fallthrough
CT: control target
= control target key end

     0   :  { %s2065_s0 = inlined_call_operand.vmem [shape: f32[16,1], index: 0, kind: input, shape index: {}]   ;;  %s2066_s1 = inlined_call_operand.vmem [shape: f32[16,1], index: 1, kind: input, shape index: {}]   ;;  %s2067_s2 = inlined_call_operand.vmem [shape: f32[16,128], index: 2, kind: input, shape index: {}]   ;;  %s2068_s3 = inlined_call_operand.vmem [shape: bf16[16,128], index: 3, kind: input, shape index: {}]   ;;  %s2069_s4 = inlined_call_operand.vmem [shape: bf16[16,128], index: 4, kind: input, shape index: {}]   ;;  %s2070_s5 = inlined_call_operand.hbm [shape: bf16[16,128], index: 5, kind: input, shape index: {}]   ;;  %s2071_s6 = inlined_call_operand.hbm [shape: bf16[16,128], index: 6, kind: input, shape index: {}]   ;;  %s2072_s7 = inlined_call_operand.hbm [shape: bf16[128,128], index: 7, kind: input, shape index: {}]   ;;  %s2073_s8 = inlined_call_operand.vmem [shape: f32[1,128], index: 8, kind: input, shape index: {}]   ;;  %s2074_s9 = inlined_call_operand.hbm [shape: bf16[128,256], index: 9, kind: input, shape index: {}]   ;;  %s2075_s10 = inlined_call_operand.vmem [shape: f32[1,256], index: 10, kind: input, shape index: {}]   ;;  %s2076_s11 = inlined_call_operand.hbm [shape: bf16[256,128], index: 11, kind: input, shape index: {}]   ;;  %s2077_s12 = inlined_call_operand.vmem [shape: f32[1,128], index: 12, kind: input, shape index: {}]   ;;  %s2078_s13 = inlined_call_operand.hbm [shape: bf16[128,128], index: 13, kind: input, shape index: {}]   ;;  %s2079_s14 = inlined_call_operand.vmem [shape: f32[1,128], index: 14, kind: input, shape index: {}]   ;;  %s2080_s15 = inlined_call_operand.hbm [shape: bf16[128,256], index: 15, kind: input, shape index: {}]   ;;  %s2081_s16 = inlined_call_operand.vmem [shape: f32[1,256], index: 16, kind: input, shape index: {}]   ;;  %s2082_s17 = inlined_call_operand.hbm [shape: bf16[256,128], index: 17, kind: input, shape index: {}]   ;;  %s2083_s18 = inlined_call_operand.vmem [shape: f32[1,128], index: 18, kind: input, shape index: {}]   ;;  %s2084_s19 = inlined_call_operand.hbm [shape: f32[16,128], index: 19, kind: output, shape index: {}]  }
   0x1   :  { %2088 = sst [smem:[#allocation23_spill]] %s2065_s0 }
   0x2   :  { %2089 = sst [smem:[#allocation24_spill]] %s2066_s1 }
   0x3   :  { %2090 = sst [smem:[#allocation25_spill]] %s2067_s2 }
   0x4   :  { %2091 = sst [smem:[#allocation26_spill]] %s2068_s3 }
   0x5   :  { %24 = vsyncpa [#allocation3], 0 }
   0x6   :  { %25 = vsyncpa [#allocation6], 0 }
   0x7   :  { %26 = vsyncpa [#allocation9], 0 }
   0x8   :  { %27 = vsyncpa [#allocation12], 0 }
   0x9   :  { %28 = vsyncpa [#allocation15], 0 }
   0xa   :  { %29 = vsyncpa [#allocation4], 0  ;;  %s57_s20 = sshll.u32 %s2071_s6, 4  ;;  %s1825_s21 = smov [#allocation5]   ;;  %s58_s20 = int_to_ptr.hbm [resolvable:$true] %s57_s20 }
   0xb   :  { %s59_s1 = sshll.u32 %s1825_s21, 4  ;;  %s85_s23 = sshll.u32 %s2074_s9, 4  ;;  %s60_s1 = int_to_ptr.vmem [resolvable:$true] %s59_s1  ;;  %s86_s23 = int_to_ptr.hbm [resolvable:$true] %s85_s23 }
   0xc   :  { %s1826_s24 = smov 64   ;;  %s1827_s25 = smov 4  }
   0xd   :  { %65 = dma.hbm_to_vmem [thread:$0]  %s58_s20, 128, %s60_s1, [#allocation6], %s1826_s24, %s1826_s24, %s1827_s25  }
   0xe   :  { %s1828_s3 = smov [#allocation8]   ;;  %s1829_s27 = smov 128  }
   0xf   :  { %s87_s26 = sshll.u32 %s1828_s3, 4  ;;  %s1830_s6 = smov 8   ;;  %s88_s26 = int_to_ptr.vmem [resolvable:$true] %s87_s26 }
  0x10   :  { %93 = dma.hbm_to_vmem [thread:$0]  %s86_s23, 2048, %s88_s26, [#allocation9], %s1829_s27, %s1829_s27, %s1830_s6  }
  0x11   :  { %s115_s9 = sshll.u32 %s2078_s13, 4  ;;  %s1831_s0 = smov [#allocation11]   ;;  %s116_s9 = int_to_ptr.hbm [resolvable:$true] %s115_s9 }
  0x12   :  { %s117_s30 = sshll.u32 %s1831_s0, 4  ;;  %s44_s1 = sshll.u32 %s2070_s5, 4  ;;  %s118_s30 = int_to_ptr.vmem [resolvable:$true] %s117_s30  ;;  %s45_s1 = int_to_ptr.hbm [resolvable:$true] %s44_s1 }
  0x13   :  { %123 = dma.hbm_to_vmem [thread:$0]  %s116_s9, 1024, %s118_s30, [#allocation12], %s1826_s24, %s1826_s24, %s1827_s25  }
  0x14   :  { %s1832_s22 = smov [#allocation2]   ;;  %s70_s26 = sshll.u32 %s2072_s7, 4  ;;  %s71_s26 = int_to_ptr.hbm [resolvable:$true] %s70_s26 }
  0x15   :  { %s46_s2 = sshll.u32 %s1832_s22, 4  ;;  %s100_s5 = sshll.u32 %s2076_s11, 4  ;;  %s47_s2 = int_to_ptr.vmem [resolvable:$true] %s46_s2  ;;  %s101_s5 = int_to_ptr.hbm [resolvable:$true] %s100_s5 }
  0x16   :  { %52 = dma.hbm_to_vmem [thread:$0]  %s45_s1, 128, %s47_s2, [#allocation3], %s1826_s24, %s1826_s24, %s1827_s25  }
  0x17   :  { %s1833_s29 = smov [#allocation7]   ;;  %s1834_s9 = smov [#allocation10]  }
  0x18   :  { %s72_s0 = sshll.u32 %s1833_s29, 4  ;;  %s102_s7 = sshll.u32 %s1834_s9, 4  ;;  %s73_s0 = int_to_ptr.vmem [resolvable:$true] %s72_s0  ;;  %s103_s7 = int_to_ptr.vmem [resolvable:$true] %s102_s7 }
  0x19   :  { %78 = dma.hbm_to_vmem [thread:$0]  %s71_s26, 1024, %s73_s0, [#allocation6], %s1826_s24, %s1826_s24, %s1827_s25  }
  0x1a   :  { %s130_s20 = sshll.u32 %s2080_s15, 4  ;;  %s145_s22 = sshll.u32 %s2082_s17, 4  ;;  %s131_s20 = int_to_ptr.hbm [resolvable:$true] %s130_s20  ;;  %s146_s22 = int_to_ptr.hbm [resolvable:$true] %s145_s22 }
  0x1b   :  { %108 = dma.hbm_to_vmem [thread:$0]  %s101_s5, 2048, %s103_s7, [#allocation9], %s1826_s24, %s1826_s24, %s1827_s25  }
  0x1c   :  { %s1835_s2 = smov [#allocation13]   ;;  %s1836_s3 = smov [#allocation14]  }
  0x1d   :  { %s132_s23 = sshll.u32 %s1835_s2, 4  ;;  %s147_s15 = sshll.u32 %s1836_s3, 4  ;;  %s133_s23 = int_to_ptr.vmem [resolvable:$true] %s132_s23  ;;  %s148_s15 = int_to_ptr.vmem [resolvable:$true] %s147_s15 }
  0x1e   :  { %138 = dma.hbm_to_vmem [thread:$0]  %s131_s20, 2048, %s133_s23, [#allocation12], %s1829_s27, %s1829_s27, %s1830_s6  }
  0x1f   :  { %153 = dma.hbm_to_vmem [thread:$0]  %s146_s22, 2048, %s148_s15, [#allocation15], %s1826_s24, %s1826_s24, %s1827_s25  }
  0x20   :  { %1813 = dma.done.wait [#allocation3], 128  }
  0x21   :  { %1814 = vsyncadd [#allocation3], 4294967168 }
  0x22   :  { %1815 = dma.done.wait [#allocation6], 1152  }
  0x23   :  { %1816 = vsyncadd [#allocation6], 4294966144 }
  0x24   :  { %1817 = dma.done.wait [#allocation9], 4096  }
  0x25   :  { %1818 = vsyncadd [#allocation9], 4294963200 }
  0x26   :  { %1819 = dma.done.wait [#allocation12], 3072  }
  0x27   :  { %1820 = vsyncadd [#allocation12], 4294964224 }
  0x28   :  { %1821 = dma.done.wait [#allocation15], 2048  }
  0x29   :  { %1822 = vsyncadd [#allocation15], 4294965248  ;;  %v1447_v0 = vld [vmem:[#allocation7 + $0x38] sm:$0xff]  ;;  %v1446_v1 = vld [vmem:[#allocation7 + $0x30] sm:$0xff]  ;;  %v1837_v2 = vmov 0   ;;  %s2092_s13 = sld [smem:[#allocation24_spill]] }
  0x2a   :  { %264 = vmatpush.bf16.msra.mxu0 %v1447_v0  ;;  %1544 = vset.pattern.permute.xlu1 %v1837_v2  ;;  %s2093_s28 = sld [smem:[#allocation23_spill]]  ;;  %v1205_v5 = vld [vmem:[#allocation8 + $0x70] sm:$0xf]  ;;  %v1463_v6 = vld [vmem:[#allocation8 + $0x74] sm:$0xf0]  ;;  %v1445_v8 = vld [vmem:[#allocation7 + $0x28] sm:$0xff] }
  0x2b   :  { %1543 = vset.pattern.permute.xlu0 %v1837_v2  ;;  %v1206_v7 = vor.u32 %v1463_v6, %v1205_v5  ;;  %v1444_v11 = vld [vmem:[#allocation7 + $0x20] sm:$0xff]  ;;  %v1443_v12 = vld [vmem:[#allocation7 + $0x18] sm:$0xff]  ;;  %v1442_v13 = vld [vmem:[#allocation7 + $0x10] sm:$0xff]  ;;  %s2094_s11 = sld [smem:[#allocation26_spill]]  ;;  %s1838_s5 = smov [#allocation16]  }
  0x2c   :  { %v1441_v14 = vld [vmem:[#allocation7 + $0x8] sm:$0xff]  ;;  %v1440_v15 = vld [vmem:[#allocation7] sm:$0xff]  ;;  %v1439_v16 = vld [vmem:[%s2069_s4] sm:$0xff]  ;;  %s2095_s2 = sld [smem:[#allocation25_spill]] }
  0x2d   :  { %439 = vmatpush.bf16.msra.mxu1 %v1206_v7  ;;  %v1197_v17 = vld [vmem:[#allocation8 + $0x60] sm:$0xf]  ;;  %v1461_v18 = vld [vmem:[#allocation8 + $0x64] sm:$0xf0]  ;;  %v1189_v20 = vld [vmem:[#allocation8 + $0x50] sm:$0xf] }
  0x2e   :  { %265 = vmatpush.bf16.msra.mxu0 %v1446_v1  ;;  %v1198_v19 = vor.u32 %v1461_v18, %v1197_v17  ;;  %v1459_v21 = vld [vmem:[#allocation8 + $0x54] sm:$0xf0]  ;;  %v1181_v23 = vld [vmem:[#allocation8 + $0x40] sm:$0xf]  ;;  %v1457_v24 = vld [vmem:[#allocation8 + $0x44] sm:$0xf0] }
  0x2f   :  { %v308_v3 = vld [vmem:[%s2092_s13] sm:$0xff]  ;;  %v309_v9 = vld [vmem:[%s2092_s13 + $0x8] sm:$0xff]  ;;  %v1190_v22 = vor.u32 %v1459_v21, %v1189_v20  ;;  %v1182_v25 = vor.u32 %v1457_v24, %v1181_v23  ;;  %v1460_v32 = vld [vmem:[#allocation8 + $0x64] sm:$0xf] }
  0x30   :  { %v292_v4 = vld [vmem:[%s2093_s28] sm:$0xff]  ;;  %316 = vperm.xlu1 %1544, %v308_v3   ;;  %v293_v10 = vld [vmem:[%s2093_s28 + $0x8] sm:$0xff]  ;;  %v1199_v33 = vld [vmem:[#allocation8 + $0x68] sm:$0xf0] }
  0x31   :  { %298 = vperm.xlu0 %1543, %v292_v4   ;;  %440 = vmatpush.bf16.msra.mxu1 %v1198_v19  ;;  %v1462_v26 = vld [vmem:[#allocation8 + $0x74] sm:$0xf]  ;;  %v1207_v27 = vld [vmem:[#allocation8 + $0x78] sm:$0xf0]  ;;  %v1173_v29 = vld [vmem:[#allocation8 + $0x30] sm:$0xf]  ;;  %v1202_v34 = vor.u32 %v1460_v32, %v1199_v33 }
  0x32   :  { %266 = vmatpush.bf16.msra.mxu0 %v1445_v8  ;;  %v1210_v28 = vor.u32 %v1462_v26, %v1207_v27  ;;  %v1455_v30 = vld [vmem:[#allocation8 + $0x34] sm:$0xf0]  ;;  %v1165_v35 = vld [vmem:[#allocation8 + $0x20] sm:$0xf]  ;;  %v1453_v36 = vld [vmem:[#allocation8 + $0x24] sm:$0xf0] }
  0x33   :  { %v1174_v31 = vor.u32 %v1455_v30, %v1173_v29  ;;  %v1166_v37 = vor.u32 %v1453_v36, %v1165_v35  ;;  %v1458_v38 = vld [vmem:[#allocation8 + $0x54] sm:$0xf]  ;;  %v1191_v39 = vld [vmem:[#allocation8 + $0x58] sm:$0xf0]  ;;  %v1157_v41 = vld [vmem:[#allocation8 + $0x10] sm:$0xf] }
  0x34   :  { %453 = vmatpush.bf16.msra.mxu2 %v1210_v28  ;;  %v1194_v40 = vor.u32 %v1458_v38, %v1191_v39  ;;  %v1451_v42 = vld [vmem:[#allocation8 + $0x14] sm:$0xf0]  ;;  %v1456_v44 = vld [vmem:[#allocation8 + $0x44] sm:$0xf]  ;;  %v1183_v45 = vld [vmem:[#allocation8 + $0x48] sm:$0xf0] }
  0x35   :  { %441 = vmatpush.bf16.msra.mxu1 %v1190_v22  ;;  %v1158_v43 = vor.u32 %v1451_v42, %v1157_v41  ;;  %v1186_v46 = vor.u32 %v1456_v44, %v1183_v45  ;;  %v1149_v47 = vld [vmem:[#allocation8] sm:$0xf]  ;;  %v1449_v48 = vld [vmem:[#allocation8 + $0x4] sm:$0xf0]  ;;  %v1454_v49 = vld [vmem:[#allocation8 + $0x34] sm:$0xf] }
  0x36   :  { %267 = vmatpush.bf16.msra.mxu0 %v1444_v11  ;;  %v1175_v50 = vld [vmem:[#allocation8 + $0x38] sm:$0xf0]  ;;  %v1150_v51 = vor.u32 %v1449_v48, %v1149_v47  ;;  %v1452_v54 = vld [vmem:[#allocation8 + $0x24] sm:$0xf]  ;;  %v1167_v55 = vld [vmem:[#allocation8 + $0x28] sm:$0xf0] }
  0x37   :  { %v1178_v52 = vor.u32 %v1454_v49, %v1175_v50  ;;  %v1488_v53 = vld [vmem:[#allocation11 + $0x38] sm:$0xff]  ;;  %v1170_v56 = vor.u32 %v1452_v54, %v1167_v55  ;;  %v1487_v57 = vld [vmem:[#allocation11 + $0x30] sm:$0xff]  ;;  %v1486_v63 = vld [vmem:[#allocation11 + $0x28] sm:$0xff] }
  0x38   :  { %321 = vperm.xlu1 %1544, %v309_v9   ;;  %454 = vmatpush.bf16.msra.mxu2 %v1202_v34  ;;  %v1545_v58 = vld [vmem:[%s2073_s8] ss:$0 sm:$0xff]  ;;  %v1450_v59 = vld [vmem:[#allocation8 + $0x14] sm:$0xf]  ;;  %v1159_v60 = vld [vmem:[#allocation8 + $0x18] sm:$0xf0] }
  0x39   :  { %303 = vperm.xlu0 %1543, %v293_v10   ;;  %442 = vmatpush.bf16.msra.mxu1 %v1182_v25  ;;  %v1162_v62 = vor.u32 %v1450_v59, %v1159_v60  ;;  %v1448_v2 = vld [vmem:[#allocation8 + $0x4] sm:$0xf]  ;;  %v1151_v3 = vld [vmem:[#allocation8 + $0x8] sm:$0xf0]  ;;  %v1484_v9 = vld [vmem:[#allocation11 + $0x18] sm:$0xff] }
  0x3a   :  { %268 = vmatpush.bf16.msra.mxu0 %v1443_v12  ;;  %v1485_v4 = vld [vmem:[#allocation11 + $0x20] sm:$0xff]  ;;  %v1154_v5 = vor.u32 %v1448_v2, %v1151_v3  ;;  %v1483_v12 = vld [vmem:[#allocation11 + $0x10] sm:$0xff]  ;;  %v1482_v18 = vld [vmem:[#allocation11 + $0x8] sm:$0xff] }
  0x3b   :  { %v1522_v20 = vld [vmem:[%s2094_s11] sm:$0xff]   ;;  %v1481_v21 = vld [vmem:[#allocation11] sm:$0xff]  ;;  %v295_v30 = vld [vmem:[%s2095_s2 + $0x8] sm:$0xff] }
  0x3c   :  { %455 = vmatpush.bf16.msra.mxu2 %v1194_v40  ;;  %v1523_v22 = vunpack.c.l.bf16 %v1522_v20  ;;  %v294_v23 = vld [vmem:[%s2095_s2] sm:$0xff]  ;;  %v1524_v26 = vunpack.c.h.bf16 %v1522_v20  ;;  %v1471_v32 = vld [vmem:[#allocation10 + $0x38] sm:$0xff]  ;;  %v1464_v59 = vld [vmem:[#allocation10] sm:$0xff] }
  0x3d   :  { %443 = vmatpush.bf16.msra.mxu1 %v1174_v31  ;;  %629 = vmatpush.bf16.msra.mxu3 %v1471_v32  ;;  %v1470_v34 = vld [vmem:[#allocation10 + $0x30] sm:$0xff]  ;;  %v1480_v50 = vld [vmem:[#allocation5] sm:$0xff] }
  0x3e   :  { %269 = vmatpush.bf16.msra.mxu0 %v1442_v13  ;;  %v1526_v39 = vld [vmem:[#allocation2] sm:$0xff]   ;;  %v1479_v54 = vld [vmem:[#allocation10 + $0x78] sm:$0xff] }
  0x3f   :  { %v1527_v44 = vunpack.c.l.bf16 %v1526_v39  ;;  %v1528_v45 = vunpack.c.h.bf16 %v1526_v39  ;;  %v1466_v55 = vld [vmem:[#allocation10 + $0x10] sm:$0xff]  ;;  %v1496_v32 = vld [vmem:[#allocation13 + $0x34] sm:$0xf0] }
  0x40   :  { %456 = vmatpush.bf16.msra.mxu2 %v1186_v46  ;;  %v1369_v60 = vld [vmem:[#allocation13 + $0x70] sm:$0xf] }
  0x41   :  { %444 = vmatpush.bf16.msra.mxu1 %v1166_v37  ;;  %630 = vmatpush.bf16.msra.mxu3 %v1470_v34  ;;  %v2023_v3 = vld [vmem:[%s2075_s10] sm:$0x3]  ;;  %v1472_v34 = vld [vmem:[#allocation10 + $0x40] sm:$0xff] }
  0x42   :  { %270 = vmatpush.bf16.msra.mxu0 %v1441_v14 }
  0x44   :  { %457 = vmatpush.bf16.msra.mxu2 %v1178_v52  ;;  %v1468_v52 = vld [vmem:[#allocation10 + $0x20] sm:$0xff] }
  0x45   :  { %445 = vmatpush.bf16.msra.mxu1 %v1158_v43 }
  0x46   :  { %271 = vmatpush.bf16.msra.mxu0 %v1440_v15 }
  0x48   :  { %458 = vmatpush.bf16.msra.mxu2 %v1170_v56  ;;  %v1478_v56 = vld [vmem:[#allocation10 + $0x70] sm:$0xff] }
  0x49   :  { %272 = vmatmul.bf16.vlgmr.msra.gmra.mxu0 %v1439_v16  ;;  %446 = vmatpush.bf16.msra.mxu1 %v1150_v51  ;;  %v1469_v51 = vld [vmem:[#allocation10 + $0x28] sm:$0xff] }
  0x4a   :  { %631 = vmatpush.bf16.msra.mxu3 %v1469_v51  ;;  %643 = vmatpush.bf16.msrb.mxu0 %v1479_v54  ;;  %v1546_v54 = vld [vmem:[%s2079_s14] ss:$0 sm:$0xff] }
  0x4c   :  { %459 = vmatpush.bf16.msra.mxu2 %v1162_v62  ;;  %v1476_v62 = vld [vmem:[#allocation10 + $0x60] sm:$0xff] }
  0x4d   :  { %733 = vmatpush.bf16.msrb.mxu1 %v1488_v53  ;;  %v1467_v53 = vld [vmem:[#allocation10 + $0x18] sm:$0xff] }
  0x4e   :  { %632 = vmatpush.bf16.msra.mxu3 %v1468_v52  ;;  %644 = vmatpush.bf16.msrb.mxu0 %v1478_v56 }
  0x50   :  { %460 = vmatpush.bf16.msra.mxu2 %v1154_v5  ;;  %v1502_v5 = vld [vmem:[#allocation13 + $0x64] sm:$0xf0] }
  0x51   :  { %734 = vmatpush.bf16.msrb.mxu1 %v1487_v57  ;;  %v1465_v57 = vld [vmem:[#allocation10 + $0x8] sm:$0xff] }
  0x52   :  { %633 = vmatpush.bf16.msra.mxu3 %v1467_v53 }
  0x55   :  { %735 = vmatpush.bf16.msrb.mxu1 %v1486_v63 }
  0x56   :  { %634 = vmatpush.bf16.msra.mxu3 %v1466_v55 }
  0x59   :  { %736 = vmatpush.bf16.msrb.mxu1 %v1485_v4  ;;  %v1361_v4 = vld [vmem:[#allocation13 + $0x60] sm:$0xf] }
  0x5a   :  { %635 = vmatpush.bf16.msra.mxu3 %v1465_v57  ;;  %v1321_v57 = vld [vmem:[#allocation13 + $0x10] sm:$0xf] }
  0x5d   :  { %737 = vmatpush.bf16.msrb.mxu1 %v1484_v9  ;;  %v1363_v9 = vld [vmem:[#allocation13 + $0x68] sm:$0xf0] }
  0x5e   :  { %636 = vmatpush.bf16.msra.mxu3 %v1464_v59  ;;  %v1492_v59 = vld [vmem:[#allocation13 + $0x14] sm:$0xf0] }
  0x61   :  { %738 = vmatpush.bf16.msrb.mxu1 %v1483_v12  ;;  %v1353_v12 = vld [vmem:[#allocation13 + $0x50] sm:$0xf] }
  0x65   :  { %739 = vmatpush.bf16.msrb.mxu1 %v1482_v18 }
  0x69   :  { %740 = vmatpush.bf16.msrb.mxu1 %v1481_v21  ;;  %v1345_v21 = vld [vmem:[#allocation13 + $0x40] sm:$0xf] }
  0xa2   :  { %v317_v16 = vpop.permute.xlu1 %316 }
  0xa3   :  { %v299_v17 = vpop.permute.xlu0 %298  ;;  %v324_v27 = vmul.f32 %v1523_v22, %v317_v16  ;;  %v1498_v22 = vld [vmem:[#allocation13 + $0x44] sm:$0xf0] }
  0xa4   :  { %v306_v28 = vmul.f32 %v299_v17, %v294_v23  ;;  %v1355_v17 = vld [vmem:[#allocation13 + $0x58] sm:$0xf0]  ;;  %v1497_v23 = vld [vmem:[#allocation13 + $0x44] sm:$0xf] }
  0xa6   :  { %v326_v38 = vadd.f32 %v324_v27, %v306_v28  ;;  %v356_v28 = vperm.slane %v2023_v3, 1 }
  0xaa   :  { %v322_v29 = vpop.permute.xlu1 %321 }
  0xab   :  { %v304_v31 = vpop.permute.xlu0 %303  ;;  %v325_v35 = vmul.f32 %v1524_v26, %v322_v29  ;;  %v1347_v26 = vld [vmem:[#allocation13 + $0x48] sm:$0xf0] }
  0xac   :  { %v307_v36 = vmul.f32 %v304_v31, %v295_v30  ;;  %v1350_v29 = vor.u32 %v1497_v23, %v1347_v26  ;;  %v1337_v31 = vld [vmem:[#allocation13 + $0x30] sm:$0xf] }
  0xae   :  { %v327_v41 = vadd.f32 %v325_v35, %v307_v36  ;;  %v1338_v35 = vor.u32 %v1496_v32, %v1337_v31  ;;  %v1495_v36 = vld [vmem:[#allocation13 + $0x34] sm:$0xf] }
  0xc6   :  { %v273_v61 = vpop.f32.mrf.mxu0 }
  0xc7   :  { %v274_v0 = vadd.f32 %v1545_v58, %v273_v61  ;;  %v1504_v61 = vld [vmem:[#allocation13 + $0x74] sm:$0xf0] }
  0xc8   :  { %v1370_v63 = vor.u32 %v1504_v61, %v1369_v60  ;;  %v1491_v60 = vld [vmem:[#allocation13 + $0x14] sm:$0xf]  ;;  %v1323_v61 = vld [vmem:[#allocation13 + $0x18] sm:$0xf0] }
  0xc9   :  { %v278_v1 = vsub.f32 0.0, %v274_v0 }
  0xca   :  { %866 = vmatpush.bf16.msrb.mxu2 %v1370_v63 }
  0xcb   :  { %v280_v6 = vmin.f32 %v278_v1, 30.0  ;;  %v1371_v1 = vld [vmem:[#allocation13 + $0x78] sm:$0xf0] }
  0xcd   :  { %v282_v7 = vmul.f32 1.442695, %v280_v6  ;;  %v1501_v6 = vld [vmem:[#allocation13 + $0x64] sm:$0xf] }
  0xce   :  { %v275_v8 = vpop.f32.mrf.mxu0 }
  0xcf   :  { %1549 = vpow2.f32 %v282_v7  ;;  %v276_v10 = vadd.f32 %v1545_v58, %v275_v8  ;;  %v1477_v58 = vld [vmem:[#allocation10 + $0x68] sm:$0xff]  ;;  %v1475_v7 = vld [vmem:[#allocation10 + $0x58] sm:$0xff]  ;;  %v1362_v8 = vor.u32 %v1502_v5, %v1361_v4 }
  0xd0   :  { %645 = vmatpush.bf16.msrb.mxu0 %v1477_v58 }
  0xd1   :  { %v279_v11 = vsub.f32 0.0, %v276_v10  ;;  %867 = vmatpush.bf16.msrb.mxu2 %v1362_v8 }
  0xd3   :  { %v281_v13 = vmin.f32 %v279_v11, 30.0  ;;  %v355_v11 = vperm.slane %v2023_v3, 0 }
  0xd4   :  { %646 = vmatpush.bf16.msrb.mxu0 %v1476_v62 }
  0xd5   :  { %v1550_v14 = vpop.eup %1549  ;;  %v284_v15 = vmul.f32 1.442695, %v281_v13  ;;  %v1500_v13 = vld [vmem:[#allocation13 + $0x54] sm:$0xf0] }
  0xd6   :  { %v286_v19 = vadd.f32 1.0, %v1550_v14  ;;  %v1499_v14 = vld [vmem:[#allocation13 + $0x54] sm:$0xf]  ;;  %v1354_v16 = vor.u32 %v1500_v13, %v1353_v12 }
  0xd7   :  { %1551 = vpow2.f32 %v284_v15  ;;  %v1474_v15 = vld [vmem:[#allocation10 + $0x50] sm:$0xff]  ;;  %v1358_v18 = vor.u32 %v1499_v14, %v1355_v17 }
  0xd8   :  { %1553 = vrcp.f32 %v286_v19  ;;  %647 = vmatpush.bf16.msrb.mxu0 %v1475_v7  ;;  %868 = vmatpush.bf16.msrb.mxu2 %v1354_v16  ;;  %v1490_v7 = vld [vmem:[#allocation13 + $0x4] sm:$0xf0] }
  0xdc   :  { %648 = vmatpush.bf16.msrb.mxu0 %v1474_v15 }
  0xdd   :  { %v1552_v24 = vpop.eup %1551 }
  0xde   :  { %v287_v25 = vadd.f32 1.0, %v1552_v24  ;;  %v1554_v33 = vpop.eup %1553  ;;  %v1473_v24 = vld [vmem:[#allocation10 + $0x48] sm:$0xff] }
  0xdf   :  { %v290_v37 = vmul.f32 %v1554_v33, %v274_v0  ;;  %v1503_v0 = vld [vmem:[#allocation13 + $0x74] sm:$0xf] }
  0xe0   :  { %1555 = vrcp.f32 %v287_v25  ;;  %v1374_v2 = vor.u32 %v1503_v0, %v1371_v1  ;;  %v1346_v25 = vor.u32 %v1498_v22, %v1345_v21  ;;  %649 = vmatpush.bf16.msrb.mxu0 %v1473_v24  ;;  %v1322_v0 = vor.u32 %v1492_v59, %v1321_v57  ;;  %v1510_v57 = vld [vmem:[#allocation14 + $0x28] sm:$0xff]  ;;  %v1517_v59 = vld [vmem:[#allocation14 + $0x60] sm:$0xff] }
  0xe1   :  { %v328_v43 = vadd.f32 %v326_v38, %v290_v37  ;;  %v1339_v37 = vld [vmem:[#allocation13 + $0x38] sm:$0xf0] }
  0xe2   :  { %880 = vmatpush.bf16.msrb.mxu3 %v1374_v2  ;;  %869 = vmatpush.bf16.msrb.mxu2 %v1346_v25  ;;  %v1326_v2 = vor.u32 %v1491_v60, %v1323_v61  ;;  %v1516_v60 = vld [vmem:[#allocation14 + $0x58] sm:$0xff] }
  0xe3   :  { %v2014_v47 = vadd.f32 %v1527_v44, %v328_v43  ;;  %v1329_v44 = vld [vmem:[#allocation13 + $0x20] sm:$0xf] }
  0xe4   :  { %650 = vmatpush.bf16.msrb.mxu0 %v1472_v34 }
  0xe6   :  { %v1556_v40 = vpop.eup %1555  ;;  %870 = vmatpush.bf16.msrb.mxu2 %v1338_v35 }
  0xe7   :  { %v291_v42 = vmul.f32 %v1556_v40, %v276_v10  ;;  %v1366_v10 = vor.u32 %v1501_v6, %v1363_v9  ;;  %v1342_v40 = vor.u32 %v1495_v36, %v1339_v37  ;;  %v1313_v6 = vld [vmem:[#allocation13] sm:$0xf]  ;;  %v1489_v9 = vld [vmem:[#allocation13 + $0x4] sm:$0xf] }
  0xe8   :  { %v1314_v8 = vor.u32 %v1490_v7, %v1313_v6 }
  0xe9   :  { %v329_v46 = vadd.f32 %v327_v41, %v291_v42  ;;  %881 = vmatpush.bf16.msrb.mxu3 %v1366_v10  ;;  %v1315_v10 = vld [vmem:[#allocation13 + $0x8] sm:$0xf0] }
  0xea   :  { %v1318_v13 = vor.u32 %v1489_v9, %v1315_v10 }
  0xeb   :  { %v2016_v48 = vadd.f32 %v1528_v45, %v329_v46  ;;  %v1494_v45 = vld [vmem:[#allocation13 + $0x24] sm:$0xf0] }
  0xec   :  { %v1330_v46 = vor.u32 %v1494_v45, %v1329_v44 }
  0xed   :  { %v336_v49 = vpack.c.bf16 %v2016_v48, %v2014_v47  ;;  %882 = vmatpush.bf16.msrb.mxu3 %v1358_v18 }
  0xee   :  { %871 = vmatpush.bf16.msrb.mxu2 %v1330_v46 }
  0xef   :  { %447 = vmatmul.bf16.vlgmr.msra.gmra.mxu1 %v336_v49  ;;  %461 = vmatmul.bf16.vlgmr.msra.gmra.mxu2 %v336_v49  ;;  %v1493_v49 = vld [vmem:[#allocation13 + $0x24] sm:$0xf] }
  0xf1   :  { %883 = vmatpush.bf16.msrb.mxu3 %v1350_v29 }
  0xf2   :  { %872 = vmatpush.bf16.msrb.mxu2 %v1322_v0  ;;  %v1515_v0 = vld [vmem:[#allocation14 + $0x50] sm:$0xff] }
  0xf5   :  { %884 = vmatpush.bf16.msrb.mxu3 %v1342_v40 }
  0xf6   :  { %873 = vmatpush.bf16.msrb.mxu2 %v1314_v8 }
  0xff   :  { %741 = vmatmul.bf16.vlgmr.msrb.gmra.mxu1 %v1480_v50  ;;  %v1331_v50 = vld [vmem:[#allocation13 + $0x28] sm:$0xf0] }
 0x100   :  { %v1334_v53 = vor.u32 %v1493_v49, %v1331_v50 }
 0x102   :  { %885 = vmatpush.bf16.msrb.mxu3 %v1334_v53  ;;  %v1512_v53 = vld [vmem:[#allocation14 + $0x38] sm:$0xff] }
 0x103   :  { %1056 = vmatpush.bf16.msra.mxu0 %v1512_v53 }
 0x106   :  { %886 = vmatpush.bf16.msrb.mxu3 %v1326_v2 }
 0x10a   :  { %887 = vmatpush.bf16.msrb.mxu3 %v1318_v13 }
 0x16c   :  { %v448_v19 = vpop.f32.mrf.mxu1 }
 0x16d   :  { %v2026_v20 = vadd.f32 %v448_v19, %v355_v11 }
 0x16f   :  { %v467_v27 = vsub.f32 0.0, %v2026_v20 }
 0x171   :  { %v471_v30 = vmin.f32 %v467_v27, 30.0 }
 0x172   :  { %v462_v33 = vpop.f32.mrf.mxu2 }
 0x173   :  { %v475_v38 = vmul.f32 1.442695, %v471_v30  ;;  %v2030_v39 = vadd.f32 %v462_v33, %v356_v28 }
 0x174   :  { %v450_v41 = vpop.f32.mrf.mxu1 }
 0x175   :  { %v468_v42 = vsub.f32 0.0, %v2030_v39  ;;  %v2033_v43 = vadd.f32 %v450_v41, %v355_v11  ;;  %1557 = vpow2.f32 %v475_v38 }
 0x177   :  { %v472_v51 = vmin.f32 %v468_v42, 30.0  ;;  %v469_v52 = vsub.f32 0.0, %v2033_v43 }
 0x179   :  { %v477_v55 = vmul.f32 1.442695, %v472_v51  ;;  %v473_v56 = vmin.f32 %v469_v52, 30.0 }
 0x17a   :  { %v464_v58 = vpop.f32.mrf.mxu2 }
 0x17b   :  { %v479_v62 = vmul.f32 1.442695, %v473_v56  ;;  %v465_v63 = vadd.f32 %v464_v58, %v356_v28  ;;  %1559 = vpow2.f32 %v477_v55  ;;  %v1558_v3 = vpop.eup %1557  ;;  %v1519_v55 = vld [vmem:[#allocation14 + $0x70] sm:$0xff]  ;;  %v1518_v58 = vld [vmem:[#allocation14 + $0x68] sm:$0xff] }
 0x17c   :  { %v742_v1 = vpop.f32.mrf.mxu1  ;;  %v483_v14 = vadd.f32 1.0, %v1558_v3  ;;  %v1506_v3 = vld [vmem:[#allocation14 + $0x8] sm:$0xff] }
 0x17d   :  { %1561 = vpow2.f32 %v479_v62  ;;  %v470_v4 = vsub.f32 0.0, %v465_v63  ;;  %v743_v5 = vadd.f32 %v1546_v54, %v742_v1  ;;  %v780_v62 = vld [vmem:[%s2081_s16] sm:$0x3] }
 0x17e   :  { %v782_v1 = vperm.slane %v780_v62, 0  ;;  %v783_v2 = vperm.slane %v780_v62, 1 }
 0x17f   :  { %v474_v11 = vmin.f32 %v470_v4, 30.0  ;;  %v747_v12 = vsub.f32 0.0, %v743_v5  ;;  %v1514_v4 = vld [vmem:[#allocation14 + $0x48] sm:$0xff] }
 0x181   :  { %v481_v15 = vmul.f32 1.442695, %v474_v11  ;;  %v749_v16 = vmin.f32 %v747_v12, 30.0  ;;  %v1560_v17 = vpop.eup %1559  ;;  %v1505_v11 = vld [vmem:[#allocation14] sm:$0xff] }
 0x182   :  { %v484_v24 = vadd.f32 1.0, %v1560_v17  ;;  %v1513_v12 = vld [vmem:[#allocation14 + $0x40] sm:$0xff] }
 0x183   :  { %v1562_v18 = vpop.eup %1561  ;;  %1563 = vpow2.f32 %v481_v15  ;;  %v751_v19 = vmul.f32 1.442695, %v749_v16 }
 0x184   :  { %1565 = vrcp.f32 %v483_v14  ;;  %v485_v21 = vadd.f32 1.0, %v1562_v18  ;;  %v744_v22 = vpop.f32.mrf.mxu1 }
 0x185   :  { %1567 = vpow2.f32 %v751_v19  ;;  %v745_v23 = vadd.f32 %v1546_v54, %v744_v22  ;;  %v1520_v54 = vld [vmem:[#allocation14 + $0x78] sm:$0xff] }
 0x186   :  { %1569 = vrcp.f32 %v485_v21  ;;  %1070 = vmatpush.bf16.msra.mxu1 %v1520_v54 }
 0x187   :  { %v748_v25 = vsub.f32 0.0, %v745_v23  ;;  %1571 = vrcp.f32 %v484_v24 }
 0x189   :  { %v1564_v26 = vpop.eup %1563  ;;  %v750_v27 = vmin.f32 %v748_v25, 30.0 }
 0x18a   :  { %v1566_v28 = vpop.eup %1565  ;;  %v486_v29 = vadd.f32 1.0, %v1564_v26  ;;  %1071 = vmatpush.bf16.msra.mxu1 %v1519_v55 }
 0x18b   :  { %v1568_v30 = vpop.eup %1567  ;;  %v753_v31 = vmul.f32 1.442695, %v750_v27  ;;  %v491_v33 = vmul.f32 %v1566_v28, %v2026_v20 }
 0x18c   :  { %v1570_v32 = vpop.eup %1569  ;;  %1573 = vrcp.f32 %v486_v29  ;;  %v755_v35 = vadd.f32 1.0, %v1568_v30 }
 0x18d   :  { %v493_v34 = vmul.f32 %v1570_v32, %v2033_v43  ;;  %1575 = vpow2.f32 %v753_v31  ;;  %v1572_v37 = vpop.eup %1571 }
 0x18e   :  { %1577 = vrcp.f32 %v755_v35  ;;  %v492_v41 = vmul.f32 %v1572_v37, %v2030_v39  ;;  %v1511_v39 = vld [vmem:[#allocation14 + $0x30] sm:$0xff]  ;;  %1072 = vmatpush.bf16.msra.mxu1 %v1518_v58 }
 0x18f   :  { %v495_v36 = vpack.c.bf16 %v493_v34, %v491_v33  ;;  %1057 = vmatpush.bf16.msra.mxu0 %v1511_v39 }
 0x191   :  { %637 = vmatmul.bf16.vlgmr.msra.gmra.mxu3 %v495_v36 }
 0x192   :  { %v1574_v38 = vpop.eup %1573  ;;  %1073 = vmatpush.bf16.msra.mxu1 %v1517_v59 }
 0x193   :  { %v1576_v40 = vpop.eup %1575  ;;  %v494_v42 = vmul.f32 %v1574_v38, %v465_v63  ;;  %1058 = vmatpush.bf16.msra.mxu0 %v1510_v57  ;;  %v1507_v63 = vld [vmem:[#allocation14 + $0x10] sm:$0xff] }
 0x194   :  { %v756_v44 = vadd.f32 1.0, %v1576_v40  ;;  %v1578_v46 = vpop.eup %1577 }
 0x195   :  { %v496_v45 = vpack.c.bf16 %v494_v42, %v492_v41  ;;  %v759_v49 = vmul.f32 %v1578_v46, %v743_v5 }
 0x196   :  { %1579 = vrcp.f32 %v756_v44  ;;  %1074 = vmatpush.bf16.msra.mxu1 %v1516_v60 }
 0x197   :  { %651 = vmatmul.bf16.vlgmr.msrb.gmra.mxu0 %v496_v45  ;;  %v761_v43 = vadd.f32 %v759_v49, %v2014_v47  ;;  %v1509_v47 = vld [vmem:[#allocation14 + $0x20] sm:$0xff] }
 0x198   :  { %1059 = vmatpush.bf16.msra.mxu0 %v1509_v47 }
 0x19a   :  { %1075 = vmatpush.bf16.msra.mxu1 %v1515_v0 }
 0x19c   :  { %v1580_v20 = vpop.eup %1579 }
 0x19d   :  { %v760_v50 = vmul.f32 %v1580_v20, %v745_v23 }
 0x19e   :  { %1076 = vmatpush.bf16.msra.mxu1 %v1514_v4 }
 0x19f   :  { %v762_v51 = vadd.f32 %v760_v50, %v2016_v48  ;;  %v1508_v48 = vld [vmem:[#allocation14 + $0x18] sm:$0xff] }
 0x1a0   :  { %1060 = vmatpush.bf16.msra.mxu0 %v1508_v48 }
 0x1a1   :  { %v763_v52 = vpack.c.bf16 %v762_v51, %v761_v43  ;;  %v1547_v43 = vld [vmem:[%s2077_s12] ss:$0 sm:$0xff]  ;;  %s1092_s12 = sshll.u32 %s1838_s5, 4  ;;  %s1093_s12 = int_to_ptr.vmem [resolvable:$true] %s1092_s12 }
 0x1a2   :  { %1077 = vmatpush.bf16.msra.mxu1 %v1513_v12  ;;  %v1548_v51 = vld [vmem:[%s2083_s18] ss:$0 sm:$0xff]  ;;  %s1094_s18 = sshll.u32 %s2084_s19, 4  ;;  %s1095_s18 = int_to_ptr.hbm [resolvable:$true] %s1094_s18 }
 0x1a3   :  { %874 = vmatmul.bf16.vlgmr.msrb.gmra.mxu2 %v763_v52  ;;  %888 = vmatmul.bf16.vlgmr.msrb.gmra.mxu3 %v763_v52 }
 0x1a4   :  { %1061 = vmatpush.bf16.msra.mxu0 %v1507_v63 }
 0x1a8   :  { %1062 = vmatpush.bf16.msra.mxu0 %v1506_v3 }
 0x1ac   :  { %1063 = vmatpush.bf16.msra.mxu0 %v1505_v11 }
 0x214   :  { %v2044_v56 = vpop.f32.mrf.mxu3  ;;  %v652_v20 = vpop.f32.mrf.mxu0 }
 0x215   :  { %v639_v52 = vadd.f32 %v1547_v43, %v2044_v56 }
 0x217   :  { %v653_v55 = vadd.f32 %v652_v20, %v639_v52 }
 0x21c   :  { %v2046_v61 = vpop.f32.mrf.mxu3  ;;  %v654_v50 = vpop.f32.mrf.mxu0 }
 0x21d   :  { %v641_v47 = vadd.f32 %v1547_v43, %v2046_v61 }
 0x21f   :  { %v655_v62 = vadd.f32 %v654_v50, %v641_v47 }
 0x226   :  { %v875_v5 = vpop.f32.mrf.mxu2  ;;  %v889_v6 = vpop.f32.mrf.mxu3 }
 0x227   :  { %v876_v7 = vadd.f32 %v875_v5, %v782_v1  ;;  %v890_v8 = vadd.f32 %v889_v6, %v783_v2 }
 0x229   :  { %v894_v9 = vsub.f32 0.0, %v876_v7  ;;  %v895_v10 = vsub.f32 0.0, %v890_v8 }
 0x22b   :  { %v898_v13 = vmin.f32 %v894_v9, 30.0  ;;  %v899_v14 = vmin.f32 %v895_v10, 30.0 }
 0x22d   :  { %v902_v15 = vmul.f32 1.442695, %v898_v13  ;;  %v904_v21 = vmul.f32 1.442695, %v899_v14 }
 0x22e   :  { %v877_v16 = vpop.f32.mrf.mxu2  ;;  %v891_v17 = vpop.f32.mrf.mxu3 }
 0x22f   :  { %v878_v18 = vadd.f32 %v877_v16, %v782_v1  ;;  %v892_v19 = vadd.f32 %v891_v17, %v783_v2  ;;  %1581 = vpow2.f32 %v902_v15 }
 0x230   :  { %1583 = vpow2.f32 %v904_v21 }
 0x231   :  { %v896_v22 = vsub.f32 0.0, %v878_v18  ;;  %v897_v23 = vsub.f32 0.0, %v892_v19 }
 0x233   :  { %v900_v24 = vmin.f32 %v896_v22, 30.0  ;;  %v901_v25 = vmin.f32 %v897_v23, 30.0 }
 0x235   :  { %v906_v26 = vmul.f32 1.442695, %v900_v24  ;;  %v908_v27 = vmul.f32 1.442695, %v901_v25  ;;  %v1582_v28 = vpop.eup %1581 }
 0x236   :  { %v1584_v29 = vpop.eup %1583  ;;  %v910_v30 = vadd.f32 1.0, %v1582_v28 }
 0x237   :  { %1585 = vpow2.f32 %v906_v26  ;;  %v911_v32 = vadd.f32 1.0, %v1584_v29 }
 0x238   :  { %1587 = vpow2.f32 %v908_v27 }
 0x239   :  { %1589 = vrcp.f32 %v910_v30 }
 0x23d   :  { %v1586_v31 = vpop.eup %1585 }
 0x23e   :  { %v912_v33 = vadd.f32 1.0, %v1586_v31  ;;  %v1588_v34 = vpop.eup %1587 }
 0x23f   :  { %v913_v35 = vadd.f32 1.0, %v1588_v34  ;;  %v1590_v36 = vpop.eup %1589 }
 0x240   :  { %1591 = vrcp.f32 %v912_v33  ;;  %v918_v40 = vmul.f32 %v1590_v36, %v876_v7 }
 0x241   :  { %1593 = vrcp.f32 %v911_v32 }
 0x242   :  { %1595 = vrcp.f32 %v913_v35 }
 0x246   :  { %v1592_v37 = vpop.eup %1591 }
 0x247   :  { %v1594_v38 = vpop.eup %1593  ;;  %v920_v41 = vmul.f32 %v1592_v37, %v878_v18 }
 0x248   :  { %v1596_v42 = vpop.eup %1595  ;;  %v919_v45 = vmul.f32 %v1594_v38, %v890_v8 }
 0x249   :  { %v922_v44 = vpack.c.bf16 %v920_v41, %v918_v40  ;;  %v921_v46 = vmul.f32 %v1596_v42, %v892_v19 }
 0x24b   :  { %1064 = vmatmul.bf16.vlgmr.msra.gmra.mxu0 %v922_v44  ;;  %v923_v49 = vpack.c.bf16 %v921_v46, %v919_v45 }
 0x24d   :  { %1078 = vmatmul.bf16.vlgmr.msra.gmra.mxu1 %v923_v49 }
 0x2c8   :  { %v1065_v53 = vpop.f32.mrf.mxu0 }
 0x2c9   :  { %v1066_v54 = vadd.f32 %v1548_v51, %v1065_v53 }
 0x2ca   :  { %v1079_v39 = vpop.f32.mrf.mxu1 }
 0x2cb   :  { %v1080_v57 = vadd.f32 %v1079_v39, %v1066_v54 }
 0x2cd   :  { %v1084_v58 = vadd.f32 %v1080_v57, %v653_v55 }
 0x2cf   :  { %1086 = vst [vmem:[#allocation16] sm:$0xff] %v1084_v58 }
 0x2d0   :  { %v1067_v59 = vpop.f32.mrf.mxu0 }
 0x2d1   :  { %v1068_v48 = vadd.f32 %v1548_v51, %v1067_v59 }
 0x2d2   :  { %v1081_v60 = vpop.f32.mrf.mxu1 }
 0x2d3   :  { %v1082_v56 = vadd.f32 %v1081_v60, %v1068_v48 }
 0x2d5   :  { %v1085_v63 = vadd.f32 %v1082_v56, %v655_v62 }
 0x2d7   :  { %1087 = vst [vmem:[#allocation16 + $0x8] sm:$0xff] %v1085_v63 }
 0x2d8   :  { %1100 = dma.vmem_to_hbm [thread:$0]  %s1093_s12, 256, %s1095_s18, [#allocation4], %s1829_s27, %s1829_s27, %s1830_s6  }
 0x2d9   :  { %1823 = dma.done.wait [#allocation4], 256  }
 0x2da   :  { %1824 = vsyncadd [#allocation4], 4294967040 }
 0x2db   :  { %1105 = vsyncpa [#allocation3], 1 }
 0x2dc   :  { %1106 = vsyncpa [#allocation6], 1 }
 0x2dd   :  { %1107 = vsyncpa [#allocation9], 1 }
 0x2de   :  { %1108 = vsyncpa [#allocation12], 1 }
 0x2df   :  { %1109 = vsyncpa [#allocation15], 1 }
 0x2e0   :  { %1110 = vsyncpa [#allocation4], 1 }

</bundles_post_ra>
